<compile_context>
chip_gen: v7x
topology: tpu7x:2x2x1
jax: 0.10.0
libtpu: 0.0.40
codegen_flags: <defaults>
</compile_context>

<pallas_src>
import math

import jax
import jax.numpy as jnp
from jax import lax
from jax.experimental import pallas as pl
from jax.experimental.pallas import tpu as pltpu

# --- small ModelArgs-consistent config ---
DIM = 32
N_HEADS = 4
N_KV_HEADS = 2
HEAD_DIM = DIM // N_HEADS            # 8
N_REP = N_HEADS // N_KV_HEADS        # 2 (repeat_interleave factor)
HIDDEN_DIM = 64                      # FFN hidden dim
SEQ = 8                              # current sequence length
CACHE = 8                            # kv-cache length already filled
T_KV = CACHE + SEQ                   # 16
BATCH = 2                            # >=2 parallel grid steps (v7x: both TCs)
ROPE_BASE = 10000.0

QW = N_HEADS * HEAD_DIM              # 32 (flattened q width)
KW = N_KV_HEADS * HEAD_DIM           # 16 (flattened k/v width)
QKW = QW + KW                        # 48 (contiguous q|k block for RoPE)
LANES = 128

# fused projection lane layout: [q|k (48) | q_sw|k_sw (48) | v (16) | pad (16)]
OFF_QK, OFF_QKS, OFF_V = 0, QKW, 2 * QKW

# weight slab row layout (bf16, 128 lanes wide)
WPROJ_R0 = 0                         # rows  0:32  fused projection
W13_R0 = DIM                         # rows 32:64  [w1 | w3]
WO_R0 = 2 * DIM                      # rows 64:96  wo padded to 128 lanes
W2_R0 = 3 * DIM                      # rows 96:160 w2 padded to 128 lanes
W_ROWS = 3 * DIM + HIDDEN_DIM        # 160

# constants slab row layout (f32, 128 lanes wide)
ROPE_R0 = 0                          # rows 0:8   [cos_qk(48) | sin_qk(48) | 0]
NW_R0 = SEQ                          # rows 8:16  row 8 = [attn_norm_w | ffn_norm_w | 0]
MASK_R0 = 2 * SEQ                    # rows 16:48 [big_mask(32,32) | 0]
CONST_ROWS = MASK_R0 + N_HEADS * SEQ  # 48

NKVC = N_KV_HEADS * CACHE            # 16 flattened cache rows (per k / per v)
KV_COLS = N_KV_HEADS * T_KV          # 32 score / mask columns
OUT_W = DIM + 2 * KW                 # 64 real output lanes (padded to 128)

SQRT_DIM = math.sqrt(DIM)
SCALE = 1.0 / math.sqrt(HEAD_DIM)


def _rmsnorm(x, w):
    # CoreMLRMSNorm forward: x * sqrt(dim) * reciprocal(vector_norm(x, -1)) * w
    # (the module stores eps but does NOT apply it in forward)
    inv = lax.rsqrt(jnp.sum(x * x, axis=-1, keepdims=True))
    return x * (SQRT_DIM * inv) * w


def transformer_block_kernel(x_ref, const_ref, kv_ref, w_ref, out_ref):
    x = x_ref[0]                                        # (S, D) f32

    rope = const_ref[ROPE_R0:ROPE_R0 + SEQ, :]          # (S, 128)
    cos_qk = rope[:, :QKW]
    sin_qk = rope[:, QKW:2 * QKW]                       # already carries (-sin,+sin)
    nw = const_ref[NW_R0:NW_R0 + SEQ, :]                # (S, 128); only row 0 used
    anw = nw[0:1, :DIM]                                 # (1, D)
    fnw = nw[0:1, DIM:2 * DIM]                          # (1, D)
    mask = const_ref[MASK_R0:MASK_R0 + N_HEADS * SEQ, :][:, :KV_COLS]  # (NH*S, 32)

    # ---- attention_norm + single fused {q|k, q_sw|k_sw, v} matmul (bf16 MXU) ----
    n1 = _rmsnorm(x, anw)                                              # f32
    proj = jnp.dot(n1.astype(jnp.bfloat16), w_ref[WPROJ_R0:WPROJ_R0 + DIM, :],
                   preferred_element_type=jnp.float32)                 # (S, 128) f32
    qk = proj[:, OFF_QK:OFF_QK + QKW]                                  # (S, 48)
    qk_sw = proj[:, OFF_QKS:OFF_QKS + QKW]                             # (S, 48) pair-swapped
    v = proj[:, OFF_V:OFF_V + KW]                                      # (S, 16)

    # ---- interleaved-pair llama RoPE: single contiguous fused multiply-add ----
    qk_r = qk * cos_qk + qk_sw * sin_qk                                # (S, 48)
    q_r = qk_r[:, :QW]                                                 # (S, 32)
    k_r = qk_r[:, QW:QW + KW]                                          # (S, 16)

    # ---- SDPA over [cache ++ new], all heads stacked on the sublane axis ----
    kv_all = kv_ref[0]                                                 # (2*NKVC, HD) f32
    kc = kv_all[:NKVC]                                                 # k cache, group-major
    vc = kv_all[NKVC:]                                                 # v cache, group-major
    k_both = jnp.concatenate(
        [kc] + [k_r[:, g * HEAD_DIM:(g + 1) * HEAD_DIM] for g in range(N_KV_HEADS)],
        axis=0).astype(jnp.bfloat16)                                   # (NKV*T_KV, HD)
    v_both = jnp.concatenate(
        [vc] + [v[:, g * HEAD_DIM:(g + 1) * HEAD_DIM] for g in range(N_KV_HEADS)],
        axis=0).astype(jnp.bfloat16)                                   # (NKV*T_KV, HD)
    q_all = jnp.concatenate(
        [q_r[:, h * HEAD_DIM:(h + 1) * HEAD_DIM] for h in range(N_HEADS)],
        axis=0).astype(jnp.bfloat16)                                   # (NH*S, HD)

    # mask already contains causal/cache structure AND -1e9 on cross-group blocks
    scores = lax.dot_general(q_all, k_both, (((1,), (1,)), ((), ())),
                             preferred_element_type=jnp.float32) * SCALE + mask
    m = jnp.max(scores, axis=-1, keepdims=True)
    e = jnp.exp(scores - m)
    p = e * pl.reciprocal(jnp.sum(e, axis=-1, keepdims=True), approx=False)  # exact
    o_all = jnp.dot(p.astype(jnp.bfloat16), v_both,
                    preferred_element_type=jnp.float32)                # (NH*S, HD)

    o = jnp.concatenate(
        [o_all[h * SEQ:(h + 1) * SEQ, :] for h in range(N_HEADS)], axis=-1)  # (S, QW)
    attn = jnp.dot(o.astype(jnp.bfloat16), w_ref[WO_R0:WO_R0 + QW, :],
                   preferred_element_type=jnp.float32)[:, :DIM]
    h1 = x + attn

    # ---- ffn_norm + SwiGLU FFN (w1|w3 fused into one 128-lane matmul) ----
    n2 = _rmsnorm(h1, fnw)
    x13 = jnp.dot(n2.astype(jnp.bfloat16), w_ref[W13_R0:W13_R0 + DIM, :],
                  preferred_element_type=jnp.float32)                  # (S, 128)
    x1 = x13[:, :HIDDEN_DIM]
    x3 = x13[:, HIDDEN_DIM:]
    hmid = x1 * jax.nn.sigmoid(x1) * x3                                # (S, HIDDEN)
    ff = jnp.dot(hmid.astype(jnp.bfloat16), w_ref[W2_R0:W2_R0 + HIDDEN_DIM, :],
                 preferred_element_type=jnp.float32)[:, :DIM]

    # single full-128-lane output store: [block_out(32) | new_k(16) | new_v(16) | 0]
    pad = jnp.zeros((SEQ, LANES - OUT_W), jnp.float32)
    out_ref[0] = jnp.concatenate([h1 + ff, k_r, v, pad], axis=-1)


def _pairwise_swap_matrix(width):
    perm = jnp.arange(width).reshape(-1, 2)[:, ::-1].reshape(-1)
    return jnp.eye(width, dtype=jnp.float32)[perm]


def transformer_block(x, freqs_cos, freqs_sin, k_cache, v_cache, attn_mask, params):
    B, S, D = x.shape
    assert (S, D) == (SEQ, DIM)

    # --- RoPE tables over the contiguous [q(32) | k(16)] lane block ---
    cos_hd = jnp.repeat(freqs_cos, 2, axis=-1)                     # (S, HD): cos[d//2]
    sin_hd = jnp.repeat(freqs_sin, 2, axis=-1)
    sign = jnp.tile(jnp.array([-1.0, 1.0], jnp.float32), HEAD_DIM // 2)
    sin_s = sin_hd * sign                                          # (-sin, +sin) pairs
    cos_qk = jnp.concatenate([jnp.tile(cos_hd, (1, N_HEADS)),
                              jnp.tile(cos_hd, (1, N_KV_HEADS))], axis=-1)   # (S, 48)
    sin_qk = jnp.concatenate([jnp.tile(sin_s, (1, N_HEADS)),
                              jnp.tile(sin_s, (1, N_KV_HEADS))], axis=-1)    # (S, 48)

    # --- additive block mask, columns reordered [all cache | all new], group-major ---
    m_cache = attn_mask[:, :CACHE]
    m_new = attn_mask[:, CACHE:]
    neg_c = jnp.full_like(m_cache, -1e9)
    neg_n = jnp.full_like(m_new, -1e9)
    big_mask = jnp.concatenate([
        jnp.concatenate(
            [m_cache if g == (h // N_REP) else neg_c for g in range(N_KV_HEADS)]
            + [m_new if g == (h // N_REP) else neg_n for g in range(N_KV_HEADS)],
            axis=-1)
        for h in range(N_HEADS)
    ], axis=0)                                                      # (NH*S, NKV*T_KV)

    # --- ONE lane-dense (48, 128) constants slab: RoPE rows | norm-w row | mask rows ---
    rope_rows = jnp.concatenate(
        [cos_qk, sin_qk, jnp.zeros((SEQ, LANES - 2 * QKW), jnp.float32)], axis=-1)
    nw_row = jnp.concatenate(
        [params["attn_norm_w"], params["ffn_norm_w"],
         jnp.zeros((1, LANES - 2 * DIM), jnp.float32)], axis=-1)
    nw_rows = jnp.concatenate([nw_row, jnp.zeros((SEQ - 1, LANES), jnp.float32)], axis=0)
    mask_rows = jnp.concatenate(
        [big_mask, jnp.zeros((N_HEADS * SEQ, LANES - KV_COLS), jnp.float32)], axis=-1)
    const = jnp.concatenate([rope_rows, nw_rows, mask_rows], axis=0)
    assert const.shape == (CONST_ROWS, LANES)

    # --- ONE (160, 128) bf16 weight slab: [wproj ; w1|w3 ; wo(pad) ; w2(pad)] ---
    swap_q = _pairwise_swap_matrix(QW)
    swap_k = _pairwise_swap_matrix(KW)
    wproj = jnp.concatenate([
        params["wq_t"], params["wk_t"],
        params["wq_t"] @ swap_q, params["wk_t"] @ swap_k,
        params["wv_t"],
        jnp.zeros((DIM, LANES - (2 * QKW + KW)), jnp.float32),
    ], axis=-1)                                                     # (32, 128)
    w13 = jnp.concatenate([params["w1_t"], params["w3_t"]], axis=-1)            # (32, 128)
    wo_pad = jnp.concatenate(
        [params["wo_t"], jnp.zeros((QW, LANES - DIM), jnp.float32)], axis=-1)   # (32, 128)
    w2_pad = jnp.concatenate(
        [params["w2_t"], jnp.zeros((HIDDEN_DIM, LANES - DIM), jnp.float32)], axis=-1)  # (64, 128)
    wslab = jnp.concatenate([wproj, w13, wo_pad, w2_pad], axis=0).astype(jnp.bfloat16)
    assert wslab.shape == (W_ROWS, LANES)

    # --- per-batch KV-cache slab: flattened group-major [k_flat ; v_flat] ---
    kv_slab = jnp.concatenate([
        k_cache.reshape(B, NKVC, HEAD_DIM),
        v_cache.reshape(B, NKVC, HEAD_DIM),
    ], axis=1)                                                      # (B, 2*NKVC, HD)

    def full2(a):
        # constant block across the batch grid axis (stays resident, no per-step re-DMA)
        return pl.BlockSpec(a.shape, lambda b: (0, 0))

    out_all = pl.pallas_call(
        transformer_block_kernel,
        out_shape=jax.ShapeDtypeStruct((B, SEQ, LANES), jnp.float32),
        grid=(B,),
        in_specs=[
            pl.BlockSpec((1, SEQ, DIM), lambda b: (b, 0, 0)),       # x
            full2(const),                                           # constants + mask slab
            pl.BlockSpec((1, 2 * NKVC, HEAD_DIM), lambda b: (b, 0, 0)),  # kv-cache slab
            full2(wslab),                                           # fused bf16 weight slab
        ],
        out_specs=pl.BlockSpec((1, SEQ, LANES), lambda b: (b, 0, 0)),
        compiler_params=pltpu.CompilerParams(dimension_semantics=("parallel",)),
    )(x, const, kv_slab, wslab)

    # split the packed 128-lane output slab (XLA-side glue)
    out = out_all[:, :, :DIM]
    new_k = out_all[:, :, DIM:DIM + KW].reshape(
        B, SEQ, N_KV_HEADS, HEAD_DIM).transpose(0, 2, 1, 3)
    new_v = out_all[:, :, DIM + KW:DIM + 2 * KW].reshape(
        B, SEQ, N_KV_HEADS, HEAD_DIM).transpose(0, 2, 1, 3)
    return out, new_k, new_v


def init_params(key):
    ks = jax.random.split(key, 8)
    s = 0.05
    return {
        "attn_norm_w": jnp.ones((1, DIM), jnp.float32),
        "ffn_norm_w": jnp.ones((1, DIM), jnp.float32),
        # nn.Linear weights pre-transposed to (in, out)
        "wq_t": s * jax.random.normal(ks[0], (DIM, N_HEADS * HEAD_DIM), jnp.float32),
        "wk_t": s * jax.random.normal(ks[1], (DIM, N_KV_HEADS * HEAD_DIM), jnp.float32),
        "wv_t": s * jax.random.normal(ks[2], (DIM, N_KV_HEADS * HEAD_DIM), jnp.float32),
        "wo_t": s * jax.random.normal(ks[3], (N_HEADS * HEAD_DIM, DIM), jnp.float32),
        "w1_t": s * jax.random.normal(ks[4], (DIM, HIDDEN_DIM), jnp.float32),
        "w3_t": s * jax.random.normal(ks[5], (DIM, HIDDEN_DIM), jnp.float32),
        "w2_t": s * jax.random.normal(ks[6], (HIDDEN_DIM, DIM), jnp.float32),
    }


if __name__ == "__main__":
    key = jax.random.PRNGKey(0)
    k_x, k_kc, k_vc, k_p = jax.random.split(key, 4)

    params = init_params(k_p)
    x = jax.random.normal(k_x, (BATCH, SEQ, DIM), jnp.float32)
    k_cache = jax.random.normal(k_kc, (BATCH, N_KV_HEADS, CACHE, HEAD_DIM), jnp.float32)
    v_cache = jax.random.normal(k_vc, (BATCH, N_KV_HEADS, CACHE, HEAD_DIM), jnp.float32)

    # precompute_freqs_cis (unscaled) for positions [CACHE, CACHE+SEQ)
    # TODO(synk): use_scaled_rope frequency smoothing not applied (table-build glue only).
    inv_freq = 1.0 / (ROPE_BASE ** (jnp.arange(0, HEAD_DIM, 2, dtype=jnp.float32) / HEAD_DIM))
    pos = jnp.arange(CACHE, CACHE + SEQ, dtype=jnp.float32)
    angles = jnp.outer(pos, inv_freq)                   # (SEQ, HEAD_DIM//2)
    freqs_cos = jnp.cos(angles)
    freqs_sin = jnp.sin(angles)

    # additive float attn_mask: cache fully visible, causal over the new tokens
    i = jnp.arange(SEQ)[:, None]
    j = jnp.arange(T_KV)[None, :]
    allowed = (j < CACHE) | ((j - CACHE) <= i)
    attn_mask = jnp.where(allowed, 0.0, -1e9).astype(jnp.float32)

    out, new_k, new_v = transformer_block(
        x, freqs_cos, freqs_sin, k_cache, v_cache, attn_mask, params)
    jax.block_until_ready((out, new_k, new_v))

    assert out.shape == (BATCH, SEQ, DIM)
    assert new_k.shape == (BATCH, N_KV_HEADS, SEQ, HEAD_DIM)
    assert new_v.shape == (BATCH, N_KV_HEADS, SEQ, HEAD_DIM)
    assert bool(jnp.all(jnp.isfinite(out)))
    print("KERNEL_OK")
</pallas_src>

<mosaic_0001>
module attributes {stable_mosaic.version = 11 : i64} {
  func.func @transformer_block_kernel(%arg0: i32, %arg1: memref<1x8x32xf32, #tpu.memory_space<vmem>>, %arg2: memref<48x128xf32, #tpu.memory_space<vmem>>, %arg3: memref<1x32x8xf32, #tpu.memory_space<vmem>>, %arg4: memref<160x128xbf16, #tpu.memory_space<vmem>>, %arg5: memref<1x8x128xf32, #tpu.memory_space<vmem>>) attributes {dimension_semantics = [#tpu.dimension_semantics<parallel>], iteration_bounds = array<i64: 2>, scalar_prefetch = 0 : i64, scratch_operands = 0 : i64, tpu.core_type = #tpu.core_type<tc>, window_params = [{transform_indices = @transform_0, window_bounds = array<i64: 1, 8, 32>}, {pipeline_mode = #tpu.pipeline_mode<synchronous>, transform_indices = @transform_1, window_bounds = array<i64: 48, 128>}, {transform_indices = @transform_2, window_bounds = array<i64: 1, 32, 8>}, {pipeline_mode = #tpu.pipeline_mode<synchronous>, transform_indices = @transform_3, window_bounds = array<i64: 160, 128>}, {transform_indices = @transform_4, window_bounds = array<i64: 1, 8, 128>}]} {
    %c0 = arith.constant 0 : index
    %c0_0 = arith.constant 0 : index
    %c0_1 = arith.constant 0 : index
    %0 = vector.load %arg1[%c0, %c0_0, %c0_1] : memref<1x8x32xf32, #tpu.memory_space<vmem>>, vector<1x8x32xf32>
    %1 = vector.shape_cast %0 : vector<1x8x32xf32> to vector<8x32xf32>
    %c0_2 = arith.constant 0 : index
    %c0_3 = arith.constant 0 : index
    %2 = vector.load %arg2[%c0_2, %c0_3] : memref<48x128xf32, #tpu.memory_space<vmem>>, vector<8x128xf32>
    %3 = vector.extract_strided_slice %2 {offsets = [0, 0], sizes = [8, 48], strides = [1, 1]} : vector<8x128xf32> to vector<8x48xf32>
    %4 = vector.extract_strided_slice %2 {offsets = [0, 48], sizes = [8, 48], strides = [1, 1]} : vector<8x128xf32> to vector<8x48xf32>
    %c8 = arith.constant 8 : index
    %c0_4 = arith.constant 0 : index
    %5 = vector.load %arg2[%c8, %c0_4] : memref<48x128xf32, #tpu.memory_space<vmem>>, vector<8x128xf32>
    %6 = vector.extract_strided_slice %5 {offsets = [0, 0], sizes = [1, 32], strides = [1, 1]} : vector<8x128xf32> to vector<1x32xf32>
    %7 = vector.extract_strided_slice %5 {offsets = [0, 32], sizes = [1, 32], strides = [1, 1]} : vector<8x128xf32> to vector<1x32xf32>
    %c16 = arith.constant 16 : index
    %c0_5 = arith.constant 0 : index
    %8 = vector.load %arg2[%c16, %c0_5] : memref<48x128xf32, #tpu.memory_space<vmem>>, vector<32x128xf32>
    %9 = vector.extract_strided_slice %8 {offsets = [0, 0], sizes = [32, 32], strides = [1, 1]} : vector<32x128xf32> to vector<32x32xf32>
    %10 = arith.mulf %1, %1 : vector<8x32xf32>
    %cst = arith.constant dense<0.000000e+00> : vector<8xf32>
    %11 = vector.multi_reduction <add>, %10, %cst [1] : vector<8x32xf32> to vector<8xf32>
    %12 = vector.shape_cast %11 : vector<8xf32> to vector<8x1xf32>
    %13 = math.rsqrt %12 : vector<8x1xf32>
    %cst_6 = arith.constant 5.65685415 : f32
    %14 = vector.broadcast %cst_6 : f32 to vector<8x1xf32>
    %15 = arith.mulf %14, %13 : vector<8x1xf32>
    %16 = vector.broadcast %15 : vector<8x1xf32> to vector<8x32xf32>
    %17 = arith.mulf %1, %16 : vector<8x32xf32>
    %18 = vector.broadcast %6 : vector<1x32xf32> to vector<8x32xf32>
    %19 = arith.mulf %17, %18 : vector<8x32xf32>
    %20 = arith.truncf %19 : vector<8x32xf32> to vector<8x32xbf16>
    %c0_7 = arith.constant 0 : index
    %c0_8 = arith.constant 0 : index
    %21 = vector.load %arg4[%c0_7, %c0_8] : memref<160x128xbf16, #tpu.memory_space<vmem>>, vector<32x128xbf16>
    %cst_9 = arith.constant dense<0.000000e+00> : vector<8x128xf32>
    %22 = tpu.matmul %20, %21, %cst_9 {dimension_numbers = #tpu.dot_dimension_numbers<[1], [0], [0], [1], [0, 0, 1, 1], [], []>} : vector<8x32xbf16>, vector<32x128xbf16>, vector<8x128xf32> -> vector<8x128xf32>
    %23 = vector.extract_strided_slice %22 {offsets = [0, 0], sizes = [8, 48], strides = [1, 1]} : vector<8x128xf32> to vector<8x48xf32>
    %24 = vector.extract_strided_slice %22 {offsets = [0, 48], sizes = [8, 48], strides = [1, 1]} : vector<8x128xf32> to vector<8x48xf32>
    %25 = vector.extract_strided_slice %22 {offsets = [0, 96], sizes = [8, 16], strides = [1, 1]} : vector<8x128xf32> to vector<8x16xf32>
    %26 = arith.mulf %23, %3 : vector<8x48xf32>
    %27 = arith.mulf %24, %4 : vector<8x48xf32>
    %28 = arith.addf %26, %27 : vector<8x48xf32>
    %29 = vector.extract_strided_slice %28 {offsets = [0, 0], sizes = [8, 32], strides = [1, 1]} : vector<8x48xf32> to vector<8x32xf32>
    %30 = vector.extract_strided_slice %28 {offsets = [0, 32], sizes = [8, 16], strides = [1, 1]} : vector<8x48xf32> to vector<8x16xf32>
    %c0_10 = arith.constant 0 : index
    %c0_11 = arith.constant 0 : index
    %c0_12 = arith.constant 0 : index
    %31 = vector.load %arg3[%c0_10, %c0_11, %c0_12] : memref<1x32x8xf32, #tpu.memory_space<vmem>>, vector<1x32x8xf32>
    %32 = vector.shape_cast %31 : vector<1x32x8xf32> to vector<32x8xf32>
    %33 = vector.extract_strided_slice %32 {offsets = [0, 0], sizes = [16, 8], strides = [1, 1]} : vector<32x8xf32> to vector<16x8xf32>
    %34 = vector.extract_strided_slice %32 {offsets = [16, 0], sizes = [16, 8], strides = [1, 1]} : vector<32x8xf32> to vector<16x8xf32>
    %35 = vector.extract_strided_slice %30 {offsets = [0, 0], sizes = [8, 8], strides = [1, 1]} : vector<8x16xf32> to vector<8x8xf32>
    %36 = vector.extract_strided_slice %30 {offsets = [0, 8], sizes = [8, 8], strides = [1, 1]} : vector<8x16xf32> to vector<8x8xf32>
    %37 = tpu.concatenate %33, %35, %36 in 0 : vector<16x8xf32>, vector<8x8xf32>, vector<8x8xf32> -> vector<32x8xf32>
    %38 = arith.truncf %37 : vector<32x8xf32> to vector<32x8xbf16>
    %39 = vector.extract_strided_slice %25 {offsets = [0, 0], sizes = [8, 8], strides = [1, 1]} : vector<8x16xf32> to vector<8x8xf32>
    %40 = vector.extract_strided_slice %25 {offsets = [0, 8], sizes = [8, 8], strides = [1, 1]} : vector<8x16xf32> to vector<8x8xf32>
    %41 = tpu.concatenate %34, %39, %40 in 0 : vector<16x8xf32>, vector<8x8xf32>, vector<8x8xf32> -> vector<32x8xf32>
    %42 = arith.truncf %41 : vector<32x8xf32> to vector<32x8xbf16>
    %43 = vector.extract_strided_slice %29 {offsets = [0, 0], sizes = [8, 8], strides = [1, 1]} : vector<8x32xf32> to vector<8x8xf32>
    %44 = vector.extract_strided_slice %29 {offsets = [0, 8], sizes = [8, 8], strides = [1, 1]} : vector<8x32xf32> to vector<8x8xf32>
    %45 = vector.extract_strided_slice %29 {offsets = [0, 16], sizes = [8, 8], strides = [1, 1]} : vector<8x32xf32> to vector<8x8xf32>
    %46 = vector.extract_strided_slice %29 {offsets = [0, 24], sizes = [8, 8], strides = [1, 1]} : vector<8x32xf32> to vector<8x8xf32>
    %47 = tpu.concatenate %43, %44, %45, %46 in 0 : vector<8x8xf32>, vector<8x8xf32>, vector<8x8xf32>, vector<8x8xf32> -> vector<32x8xf32>
    %48 = arith.truncf %47 : vector<32x8xf32> to vector<32x8xbf16>
    %cst_13 = arith.constant dense<0.000000e+00> : vector<32x32xf32>
    %49 = tpu.matmul %48, %38, %cst_13 {dimension_numbers = #tpu.dot_dimension_numbers<[1], [1], [0], [0], [0, 0, 1, 0], [], []>} : vector<32x8xbf16>, vector<32x8xbf16>, vector<32x32xf32> -> vector<32x32xf32>
    %cst_14 = arith.constant 0.353553385 : f32
    %50 = vector.broadcast %cst_14 : f32 to vector<32x32xf32>
    %51 = arith.mulf %49, %50 : vector<32x32xf32>
    %52 = arith.addf %51, %9 : vector<32x32xf32>
    %cst_15 = arith.constant dense<0xFF800000> : vector<32xf32>
    %53 = vector.multi_reduction <maximumf>, %52, %cst_15 [1] : vector<32x32xf32> to vector<32xf32>
    %54 = vector.shape_cast %53 : vector<32xf32> to vector<32x1xf32>
    %55 = vector.broadcast %54 : vector<32x1xf32> to vector<32x32xf32>
    %56 = arith.subf %52, %55 : vector<32x32xf32>
    %57 = math.exp %56 : vector<32x32xf32>
    %cst_16 = arith.constant dense<0.000000e+00> : vector<32xf32>
    %58 = vector.multi_reduction <add>, %57, %cst_16 [1] : vector<32x32xf32> to vector<32xf32>
    %59 = vector.shape_cast %58 : vector<32xf32> to vector<32x1xf32>
    %60 = tpu.reciprocal %59 : vector<32x1xf32> -> vector<32x1xf32>
    %61 = vector.broadcast %60 : vector<32x1xf32> to vector<32x32xf32>
    %62 = arith.mulf %57, %61 : vector<32x32xf32>
    %63 = arith.truncf %62 : vector<32x32xf32> to vector<32x32xbf16>
    %cst_17 = arith.constant dense<0.000000e+00> : vector<32x8xf32>
    %64 = tpu.matmul %63, %42, %cst_17 {dimension_numbers = #tpu.dot_dimension_numbers<[1], [0], [0], [1], [0, 0, 1, 1], [], []>} : vector<32x32xbf16>, vector<32x8xbf16>, vector<32x8xf32> -> vector<32x8xf32>
    %65 = vector.extract_strided_slice %64 {offsets = [0, 0], sizes = [8, 8], strides = [1, 1]} : vector<32x8xf32> to vector<8x8xf32>
    %66 = vector.extract_strided_slice %64 {offsets = [8, 0], sizes = [8, 8], strides = [1, 1]} : vector<32x8xf32> to vector<8x8xf32>
    %67 = vector.extract_strided_slice %64 {offsets = [16, 0], sizes = [8, 8], strides = [1, 1]} : vector<32x8xf32> to vector<8x8xf32>
    %68 = vector.extract_strided_slice %64 {offsets = [24, 0], sizes = [8, 8], strides = [1, 1]} : vector<32x8xf32> to vector<8x8xf32>
    %69 = tpu.concatenate %65, %66, %67, %68 in 1 : vector<8x8xf32>, vector<8x8xf32>, vector<8x8xf32>, vector<8x8xf32> -> vector<8x32xf32>
    %70 = arith.truncf %69 : vector<8x32xf32> to vector<8x32xbf16>
    %c64 = arith.constant 64 : index
    %c0_18 = arith.constant 0 : index
    %71 = vector.load %arg4[%c64, %c0_18] : memref<160x128xbf16, #tpu.memory_space<vmem>>, vector<32x128xbf16>
    %cst_19 = arith.constant dense<0.000000e+00> : vector<8x128xf32>
    %72 = tpu.matmul %70, %71, %cst_19 {dimension_numbers = #tpu.dot_dimension_numbers<[1], [0], [0], [1], [0, 0, 1, 1], [], []>} : vector<8x32xbf16>, vector<32x128xbf16>, vector<8x128xf32> -> vector<8x128xf32>
    %73 = vector.extract_strided_slice %72 {offsets = [0, 0], sizes = [8, 32], strides = [1, 1]} : vector<8x128xf32> to vector<8x32xf32>
    %74 = arith.addf %1, %73 : vector<8x32xf32>
    %75 = arith.mulf %74, %74 : vector<8x32xf32>
    %cst_20 = arith.constant dense<0.000000e+00> : vector<8xf32>
    %76 = vector.multi_reduction <add>, %75, %cst_20 [1] : vector<8x32xf32> to vector<8xf32>
    %77 = vector.shape_cast %76 : vector<8xf32> to vector<8x1xf32>
    %78 = math.rsqrt %77 : vector<8x1xf32>
    %cst_21 = arith.constant 5.65685415 : f32
    %79 = vector.broadcast %cst_21 : f32 to vector<8x1xf32>
    %80 = arith.mulf %79, %78 : vector<8x1xf32>
    %81 = vector.broadcast %80 : vector<8x1xf32> to vector<8x32xf32>
    %82 = arith.mulf %74, %81 : vector<8x32xf32>
    %83 = vector.broadcast %7 : vector<1x32xf32> to vector<8x32xf32>
    %84 = arith.mulf %82, %83 : vector<8x32xf32>
    %85 = arith.truncf %84 : vector<8x32xf32> to vector<8x32xbf16>
    %c32 = arith.constant 32 : index
    %c0_22 = arith.constant 0 : index
    %86 = vector.load %arg4[%c32, %c0_22] : memref<160x128xbf16, #tpu.memory_space<vmem>>, vector<32x128xbf16>
    %cst_23 = arith.constant dense<0.000000e+00> : vector<8x128xf32>
    %87 = tpu.matmul %85, %86, %cst_23 {dimension_numbers = #tpu.dot_dimension_numbers<[1], [0], [0], [1], [0, 0, 1, 1], [], []>} : vector<8x32xbf16>, vector<32x128xbf16>, vector<8x128xf32> -> vector<8x128xf32>
    %88 = vector.extract_strided_slice %87 {offsets = [0, 0], sizes = [8, 64], strides = [1, 1]} : vector<8x128xf32> to vector<8x64xf32>
    %89 = vector.extract_strided_slice %87 {offsets = [0, 64], sizes = [8, 64], strides = [1, 1]} : vector<8x128xf32> to vector<8x64xf32>
    %90 = arith.negf %88 : vector<8x64xf32>
    %91 = math.exp %90 : vector<8x64xf32>
    %cst_24 = arith.constant 1.000000e+00 : f32
    %92 = vector.broadcast %cst_24 : f32 to vector<8x64xf32>
    %93 = arith.addf %92, %91 : vector<8x64xf32>
    %94 = arith.divf %92, %93 : vector<8x64xf32>
    %95 = arith.mulf %88, %94 : vector<8x64xf32>
    %96 = arith.mulf %95, %89 : vector<8x64xf32>
    %97 = arith.truncf %96 : vector<8x64xf32> to vector<8x64xbf16>
    %c96 = arith.constant 96 : index
    %c0_25 = arith.constant 0 : index
    %98 = vector.load %arg4[%c96, %c0_25] : memref<160x128xbf16, #tpu.memory_space<vmem>>, vector<64x128xbf16>
    %cst_26 = arith.constant dense<0.000000e+00> : vector<8x128xf32>
    %99 = tpu.matmul %97, %98, %cst_26 {dimension_numbers = #tpu.dot_dimension_numbers<[1], [0], [0], [1], [0, 0, 1, 1], [], []>} : vector<8x64xbf16>, vector<64x128xbf16>, vector<8x128xf32> -> vector<8x128xf32>
    %100 = vector.extract_strided_slice %99 {offsets = [0, 0], sizes = [8, 32], strides = [1, 1]} : vector<8x128xf32> to vector<8x32xf32>
    %cst_27 = arith.constant 0.000000e+00 : f32
    %101 = vector.broadcast %cst_27 : f32 to vector<8x64xf32>
    %102 = arith.addf %74, %100 : vector<8x32xf32>
    %103 = tpu.concatenate %102, %30, %25, %101 in 1 : vector<8x32xf32>, vector<8x16xf32>, vector<8x16xf32>, vector<8x64xf32> -> vector<8x128xf32>
    %c0_28 = arith.constant 0 : index
    %c0_29 = arith.constant 0 : index
    %c0_30 = arith.constant 0 : index
    %104 = vector.load %arg5[%c0_28, %c0_29, %c0_30] : memref<1x8x128xf32, #tpu.memory_space<vmem>>, vector<1x8x128xf32>
    %105 = vector.shape_cast %104 : vector<1x8x128xf32> to vector<8x128xf32>
    %106 = vector.shape_cast %103 : vector<8x128xf32> to vector<1x8x128xf32>
    tpu.vector_store %arg5[%c0_28, %c0_29, %c0_30], %106 {strides = array<i32>} : memref<1x8x128xf32, #tpu.memory_space<vmem>>, vector<1x8x128xf32>,
    return
  }
  func.func @transform_0(%arg0: i32) -> (i32, i32, i32) {
    %c0_i32 = arith.constant 0 : i32
    %c0_i32_0 = arith.constant 0 : i32
    %c0_i32_1 = arith.constant 0 : i32
    return %arg0, %c0_i32, %c0_i32_0 : i32, i32, i32
  }
  func.func @transform_1(%arg0: i32) -> (i32, i32) {
    %c0_i32 = arith.constant 0 : i32
    %c0_i32_0 = arith.constant 0 : i32
    %c0_i32_1 = arith.constant 0 : i32
    return %c0_i32, %c0_i32_0 : i32, i32
  }
  func.func @transform_2(%arg0: i32) -> (i32, i32, i32) {
    %c0_i32 = arith.constant 0 : i32
    %c0_i32_0 = arith.constant 0 : i32
    %c0_i32_1 = arith.constant 0 : i32
    return %arg0, %c0_i32, %c0_i32_0 : i32, i32, i32
  }
  func.func @transform_3(%arg0: i32) -> (i32, i32) {
    %c0_i32 = arith.constant 0 : i32
    %c0_i32_0 = arith.constant 0 : i32
    %c0_i32_1 = arith.constant 0 : i32
    return %c0_i32, %c0_i32_0 : i32, i32
  }
  func.func @transform_4(%arg0: i32) -> (i32, i32, i32) {
    %c0_i32 = arith.constant 0 : i32
    %c0_i32_0 = arith.constant 0 : i32
    %c0_i32_1 = arith.constant 0 : i32
    return %arg0, %c0_i32, %c0_i32_0 : i32, i32, i32
  }
}

</mosaic_0001>

<bundles_post_ra>
// kernel: tpu_custom_call.1
= control target key start
LH: loop header
LB: loop body
LE: loop exit
PB: predicated region body
PF: predicated region fallthrough
CT: control target
= control target key end

     0   :  { %9 = vsyncpa [#allocation3], 0  ;;  %s1599_s0 = inlined_call_operand.hbm [shape: f32[2,8,32], index: 0, kind: input, shape index: {}]   ;;  %s1600_s1 = inlined_call_operand.hbm [shape: f32[48,128], index: 1, kind: input, shape index: {}]   ;;  %s1601_s2 = inlined_call_operand.vmem [shape: f32[2,32,8], index: 2, kind: input, shape index: {}]   ;;  %s1602_s3 = inlined_call_operand.vmem [shape: bf16[160,128], index: 3, kind: input, shape index: {}]   ;;  %s1603_s4 = inlined_call_operand.hbm [shape: f32[2,8,128], index: 4, kind: output, shape index: {}]  }
   0x1   :  { %11 = vsyncpa [#allocation3 + $0x1], 0 }
   0x2   :  { %12 = vsyncpa [#allocation6], 0 }
   0x3   :  { %13 = vsyncpa [#allocation4], 0 }
   0x4   :  { %15 = vsyncpa [#allocation4 + $0x1], 0  ;;  %s1284_s15 = smov 0   ;;  %s1286_s16 = smov 0  }
   0x5   :  { %s1288_s17 = smov 0   ;;  %s1290_s18 = smov 0  }
   0x6 LB: > { %s1305_s19 = sadd.s32 4294967295, %s1239_s18   ;;  %s893_s20 = sadd.s32 4294967294, %s1239_s18   ;;  %s1239_s18 = sphi %s1290_s18, %s1623_s18   ;;  %s1235_s17 = sphi %s1288_s17, %s1622_s17   ;;  %s1231_s16 = sphi %s1286_s16, %s1621_s16   ;;  %s1227_s15 = sphi %s1284_s15, %s1620_s15  }
   0x7   : > { %p41_p0 = scmp.ne.s32.totalorder %s1231_s16, %s1227_s15  ;;  %p1604_p1 = scmp.eq.s32.totalorder %s1305_s19, 0 }
   0x8   : > { %p139_p3 = scmp.eq.s32.totalorder %s893_s20, 1  ;;  %p894_p5 = scmp.ge.s32.totalorder %s1239_s18, 1 }
   0x9   : > { %p1314_p4 = por %p1604_p1, %p41_p0  ;;  %p146_p7 = scmp.lt.s32.totalorder %s1239_s18, 3 }
   0xa   : > { %p1319_p6 = por %p139_p3, %p41_p0  ;;  %s1241_s24 = smov [#allocation5]  }
   0xb   : > { %s1607_s21 = scalar_select %p1314_p4, 1, 0 }
   0xc   : > { %s1608_s22 = scalar_select %p1319_p6, 1, 0 }
   0xd   : > { %p1324_p8 = pnand %p894_p5, %p146_p7  ;;  %s158_s25 = sshll.u32 %s1241_s24, 4  ;;  %s1328_s25 = int_to_ptr.vmem [resolvable:$true] %s158_s25 }
   0xe   : > { %s1340_s27 = sadd.s32 1, %s1239_s18   ;;  %s28_s28 = sadd.s32 1, %s1235_s17 }
   0xf   : > { %s1609_s23 = scalar_select %p1324_p8, 1, 0 }
  0x10   : > { %p1013_p9 = pneg %p1324_p8  ;;  %s25_s29 = ssub.s32 %s1239_s18, %s1340_s27 }
  0x11   : > { %s1111_s6 = scalar_lea.hbm %s1600_s1, 768 }
  0x12   : > { %p1335_p11 = pnand %p1013_p9, %p1604_p1  ;;  %p1112_p12 = scmp.ne.s32.totalorder %s1600_s1, %s1111_s6 }
  0x13   : > { %p1118_p5 = scmp.lt.u32.totalorder %s1111_s6, %s1600_s1 }
  0x14   : > { %p1113_p13 = pneg %p1335_p11 }
  0x16   : > { %p1114_p0 = pnand %p1113_p13, %p1112_p12 }
  0x18   : > { %p1115_p3 = pneg %p1114_p0 }
  0x1a   : > { %p1120_p7 = pnand %p1118_p5, %p1115_p3 }
  0x1c   : > { %1123 = shalt.err (!%p1120_p7)
}
  0x1d   : > { %s1124_s11 = scalar_lea.vmem %s1328_s25, 768  ;;  %p1132_p2 = scmp.lt.s32.totalorder %s1328_s25, %s1328_s25 }
  0x1e   : > { %p1125_p9 = scmp.ne.s32.totalorder %s1328_s25, %s1124_s11  ;;  %p1133_p6 = scmp.lt.s32.totalorder %s1124_s11, %s1124_s11 }
  0x20   : > { %p1127_p10 = pnand %p1125_p9, %p1113_p13  ;;  %p1134_p4 = por %p1133_p6, %p1132_p2 }
  0x22   : > { %p1128_p1 = pneg %p1127_p10 }
  0x24   : > { %p1135_p8 = pnand %p1134_p4, %p1128_p1 }
  0x26   : > { %1138 = shalt.err (!%p1135_p8)
}
  0x27   : > { %s1242_s12 = smov 128   ;;  %s1243_s13 = smov 8  }
  0x28   : > { %1016 = dma.hbm_to_vmem [thread:$0]  (!%p1335_p11), %s1600_s1, 768, %s1328_s25, [#allocation6], %s1242_s12, %s1242_s12, %s1243_s13  }
  0x29   : > { %p26_p2 = scmp.eq.s32.totalorder %s25_s29, 0  ;;  %p35_p1 = scmp.ne.s32.totalorder %s1235_s17, %s1231_s16 }
  0x2a   : > { %p36_p4 = scmp.eq.s32.totalorder %s1239_s18, 0  ;;  %p1026_p6 = scmp.lt.s32.totalorder %s1239_s18, 2 }
  0x2b   : > { %s1371_s24 = scalar_select %p26_p2, %s1235_s17, %s28_s28  }
  0x2c   : > { %p37_p8 = por %p36_p4, %p35_p1  ;;  %p1611_p10 = scmp.eq.s32.totalorder %s1305_s19, 1 }
  0x2d   : > { %s175_s5 = sand.u32 1, %s1235_s17   ;;  %s898_s6 = sshll.u32 %s1239_s18, 7 }
  0x2e   : > { %p1375_p12 = por %p1611_p10, %p35_p1  ;;  %s897_s7 = sshll.u32 %s175_s5, 3 }
  0x2f   : > { %s1384_s9 = scalar_lea.hbm %s1599_s0, %s898_s6  ;;  %s179_s25 = scalar_lea.vmem [#allocation2], %s897_s7 }
  0x30   : > { %s186_s28 = sshll.u32 %s179_s25, 4  ;;  %p1386_p11 = pnand %p1026_p6, %p37_p8  ;;  %s1390_s28 = int_to_ptr.vmem [resolvable:$true] %s186_s28 }
  0x31   : > { %s176_s10 = scalar_lea.sflag [#allocation3], %s175_s5  ;;  %s1139_s11 = scalar_lea.hbm %s1384_s9, 128 }
  0x32   : > { %p1140_p13 = scmp.ne.s32.totalorder %s1384_s9, %s1139_s11  ;;  %p1141_p0 = pneg %p1386_p11 }
  0x33   : > { %s1144_s14 = scalar_lea.hbm %s1599_s0, 256  ;;  %p1145_p7 = scmp.lt.u32.totalorder %s1384_s9, %s1599_s0 }
  0x34   : > { %p1142_p3 = pnand %p1141_p0, %p1140_p13  ;;  %p1146_p9 = scmp.lt.u32.totalorder %s1144_s14, %s1139_s11 }
  0x35   : > { %p1148_p1 = scmp.lt.u32.totalorder %s1139_s11, %s1384_s9 }
  0x36   : > { %p1143_p5 = pneg %p1142_p3  ;;  %p1147_p2 = por %p1146_p9, %p1145_p7 }
  0x38   : > { %p1149_p4 = por %p1148_p1, %p1147_p2 }
  0x3a   : > { %p1150_p6 = pnand %p1149_p4, %p1143_p5 }
  0x3c   : > { %1153 = shalt.err (!%p1150_p6)
}
  0x3d   : > { %s1154_s5 = scalar_lea.vmem %s1390_s28, 128  ;;  %s1244_s7 = smov [#allocation2]  }
  0x3e   : > { %p1155_p8 = scmp.ne.s32.totalorder %s1390_s28, %s1154_s5  ;;  %s1159_s26 = sshll.u32 %s1244_s7, 4  ;;  %s1160_s26 = int_to_ptr.vmem [resolvable:$false] %s1159_s26 }
  0x3f   : > { %s1161_s8 = scalar_lea.vmem %s1160_s26, 256  ;;  %p1162_p3 = scmp.lt.s32.totalorder %s1390_s28, %s1160_s26 }
  0x40   : > { %p1157_p10 = pnand %p1155_p8, %p1141_p0  ;;  %p1163_p7 = scmp.lt.s32.totalorder %s1161_s8, %s1154_s5 }
  0x42   : > { %p1158_p13 = pneg %p1157_p10  ;;  %p1164_p9 = por %p1163_p7, %p1162_p3 }
  0x44   : > { %p1165_p2 = pnand %p1164_p9, %p1158_p13 }
  0x46   : > { %1168 = shalt.err (!%p1165_p2)
}
  0x47   : > { %1020 = dma.hbm_to_vmem [thread:$0]  (!%p1386_p11), %s1384_s9, 128, %s1390_s28, %s176_s10  }
  0x48   : > { %p1614_p5 = scmp.ne.s32.totalorder %s1609_s23, 0 }
  0x49   : > { %s1420_s25 = sand.u32 (!%p1614_p5), 1, %s1231_s16   ;;  %p1615_p0 = scmp.ne.s32.totalorder (!%p1614_p5), %s1607_s21, 0 }
  0x4a   : > { %203 = sbr.rel (%p1614_p5) target bundleno = 2536 (0x9e8), region = 36  ;;  %s900_s11 = sshll.u32 (!%p1614_p5), %s1420_s25, 3 }
  0x4b   : > { %s206_s12 = scalar_lea.sflag (!%p1614_p5), [#allocation3], %s1420_s25  ;;  %s209_s13 = scalar_lea.vmem (!%p1614_p5), [#allocation2], %s900_s11 }
  0x51   : > { %1214 = dma.done.wait (%p1615_p0), %s206_s12, 128  }
  0x52   : > { %1216 = vsyncadd (%p1615_p0), %s206_s12, 4294967168  ;;  %p1616_p11 = scmp.eq.s32.totalorder %s1305_s19, 0 }
  0x54   : > { %1218 = dma.done.wait (%p1616_p11), [#allocation6], 768   ;;  %p1617_p1 = pmov %p1616_p11 }
  0x55   : > { %v1434_v0 = vld [vmem:[%s209_s13] sm:$0xff]  ;;  %vm257_vm0 = vcmask 261120   ;;  %v1245_v4 = vmov 0.0   ;;  %vm1246_vm1 = vmmov 0   ;;  %v264_v6 = vlaneseq  ;;  %v251_v10 = vld [vmem:[#allocation5 + $0x8] sm:$0xff]  ;;  %v250_v17 = vld [vmem:[#allocation5] sm:$0xff] }
  0x56   : > { %1220 = vsyncadd (%p1617_p1), [#allocation6], 4294966528  ;;  %v256_v1 = vmul.f32 %v1434_v0, %v1434_v0  ;;  %v1077_v3 = vld [vmem:[%s1602_s3] sm:$0xff]   ;;  %951 = vmatprep.subr.bf16.mxu1 %v1245_v4  ;;  %v1078_v5 = vld [vmem:[%s1602_s3 + $0x8] sm:$0xff]   ;;  %955 = vmatprep.mubr.msk.bf16.mxu1 %vm1246_vm1, %v1245_v4  ;;  %s1247_s29 = smov 80   ;;  %p243_p4 = scmp.lt.s32.totalorder %s1305_s19, 1 }
  0x57   : > { %952 = vmatpush3.bf16.msra.mxu1 %v1077_v3  ;;  %v265_v8 = vshrl.u32 %v264_v6, 7  ;;  %vm368_vm2 = vcmask 64512   ;;  %s1248_s7 = smov 96   ;;  %s1249_s26 = smov 88   ;;  %v252_v40 = vld [vmem:[#allocation5 + $0x10] sm:$0xff]  ;;  %v253_v45 = vld [vmem:[#allocation5 + $0x18] sm:$0xff] }
  0x58   : > { %v258_v2 = vsel %vm257_vm0, %v256_v1, 0.0  ;;  %953 = vmatprep.subr.bf16.mxu1 %v1245_v4  ;;  %s244_s10 = scalar_select %p243_p4, %s1305_s19, 1  ;;  %v254_v46 = vld [vmem:[#allocation5 + $0x20] sm:$0xff]  ;;  %v255_v50 = vld [vmem:[#allocation5 + $0x28] sm:$0xff]  ;;  %vm552_vm3 = vcmask 130048   ;;  %vm554_vm4 = vcmask 195584  }
  0x59   : > { %259 = vadd.xlane.f32.xlu0 %v258_v2  ;;  %v266_v9 = vsub.s32 0, %v265_v8  ;;  %s1250_s8 = smov 120   ;;  %s1251_s12 = smov 112   ;;  %vm734_vm5 = vcmask 523264   ;;  %vm783_vm6 = vcmask 392192  }
  0x5a   : > { %s928_s14 = sshll.u32 %s244_s10, 5  ;;  %s1252_s13 = smov 104  }
  0x5b   : > { %954 = vmatpush3.bf16.msra.mxu1 %v1078_v5  ;;  %v1449_v12 = vrot.slane %v251_v10, %v266_v9  ;;  %s1463_s5 = scalar_lea.vmem %s1601_s2, %s928_s14  ;;  %s1253_s23 = smov 32  }
  0x5c   : > { %v335_v23 = vld [vmem:[%s1463_s5] sm:$0xff]  ;;  %v336_v24 = vld [vmem:[%s1463_s5 + $0x8] sm:$0xff]  ;;  %s1254_s9 = smov 24   ;;  %s1255_s20 = smov 8  }
  0x5d   : > { %v346_v25 = vpack.c.bf16 %v336_v24, %v335_v23  ;;  %s1256_s6 = smov 16  }
  0x5f   : > { %1003 = vmatprep.subr.msk.bf16.mxu1 %vm368_vm2, %v346_v25  ;;  %v376_v26 = vsel %vm368_vm2, %v346_v25, 0 }
  0xe6   : > { %v260_v7 = vpop.xlane.xlu0 %259 }
  0xe7   : > { %1087 = vrsqrt.f32 %v260_v7 }
  0xf1   : > { %v1088_v11 = vpop.eup %1087 }
  0xf2   : > { %v262_v13 = vmul.f32 5.656854, %v1088_v11 }
  0xf4   : > { %v263_v14 = vmul.f32 %v262_v13, %v1434_v0 }
  0xf6   : > { %v268_v15 = vmul.f32 %v1449_v12, %v263_v14 }
  0xf8   : > { %v269_v16 = vpack.c.bf16 %v268_v15, %v268_v15 }
  0xfa   : > { %956 = vmatmul.mubr.msk.bf16.vlgmr.msra.gmra.mrb[0].mxu1 %vm257_vm0, %v269_v16 }
  0xfb   : > { %960 = vmatpush3.bf16.xpose.msra.mxu1 %v376_v26 }
 0x1cd   : > { %v1454_v18 = vpop.f32.mrb[0].mxu1 }
 0x1ce   : > { %v957_v19 = vpop.f32.mrb[1].mxu1  ;;  %v329_v20 = vmul.f32 %v1454_v18, %v250_v17  ;;  %v337_v17 = vld [vmem:[%s1463_s5 + $0x10] sm:$0xff] }
 0x1cf   : > { %v326_v21 = vpop.f32.mrb[2].mxu1  ;;  %v338_v19 = vld [vmem:[%s1463_s5 + $0x18] sm:$0xff] }
 0x1d0   : > { %331 = vrot.lane.b32.xlu0 %v329_v20, %s1247_s29  ;;  %v958_v22 = vpop.f32.mrb[3].mxu1 }
 0x242   : > { %v332_v27 = vpop.permute.xlu0 %331 }
 0x243   : > { %v1469_v28 = vadd.f32 %v332_v27, %v329_v20  ;;  %v355_v20 = vpack.c.bf16 %v338_v19, %v337_v17 }
 0x245   : > { %340 = vrot.lane.b32.xlu1 %v1469_v28, %s1248_s7  ;;  %967 = vmatprep.subr.bf16.mxu0 %v355_v20 }
 0x246   : > { %968 = vmatpush3.bf16.msra.mxu0 %v355_v20 }
 0x249   : > { %343 = vrot.lane.b32.xlu1 %v1469_v28, %s1249_s26 }
 0x24d   : > { %357 = vrot.lane.b32.xlu1 %v1469_v28, %s1250_s8 }
 0x251   : > { %360 = vrot.lane.b32.xlu1 %v1469_v28, %s1251_s12  ;;  %s1258_s12 = smov [#allocation7]  }
 0x255   : > { %363 = vrot.lane.b32.xlu1 %v1469_v28, %s1252_s13  ;;  %s1173_s13 = sshll.u32 %s1258_s12, 4  ;;  %s1174_s13 = int_to_ptr.vmem [resolvable:$false] %s1173_s13 }
 0x2b7   : > { %v341_v29 = vpop.permute.xlu1 %340 }
 0x2bb   : > { %v344_v30 = vpop.permute.xlu1 %343 }
 0x2bc   : > { %v347_v31 = vpack.c.bf16 %v344_v30, %v341_v29 }
 0x2be   : > { %v379_v32 = vsel %vm368_vm2, %v347_v31, 0  ;;  %1004 = vmatprep.subr.msk.bf16.mxu1 %vm368_vm2, %v347_v31 }
 0x2bf   : > { %962 = vmatpush3.bf16.xpose.msra.mxu1 %v379_v32  ;;  %v358_v33 = vpop.permute.xlu1 %357 }
 0x2c0   : > { %v366_v34 = vpack.c.bf16 %v358_v33, %v1469_v28  ;;  %983 = vmatprep.subr.bf16.mxu1 %v1245_v4 }
 0x2c2   : > { %963 = vmatprep.mubr.msk.bf16.mxu1 %vm368_vm2, %v366_v34 }
 0x2c3   : > { %v361_v35 = vpop.permute.xlu1 %360 }
 0x2c7   : > { %v364_v36 = vpop.permute.xlu1 %363 }
 0x2c8   : > { %v367_v37 = vpack.c.bf16 %v364_v36, %v361_v35 }
 0x2ca   : > { %964 = vmatmul.mubr.msk.bf16.vlgmr.msra.gmra.mrb[4].mxu1 %vm368_vm2, %v367_v37 }
 0x2cb   : > { %987 = vmatprep.mubr.msk.bf16.mxu1 %vm1246_vm1, %v1245_v4 }
 0x39d   : > { %v965_v38 = vpop.f32.mrb[4].mxu1 }
 0x39e   : > { %v415_v39 = vpop.f32.mrb[5].mxu1  ;;  %v432_v41 = vmul.f32 0.35355338, %v965_v38 }
 0x39f   : > { %v430_v42 = vmul.f32 0.35355338, %v415_v39  ;;  %v966_v43 = vpop.f32.mrb[6].mxu1  ;;  %v1079_v39 = vld [vmem:[%s1602_s3 + $0x20] sm:$0xff]  }
 0x3a0   : > { %v418_v44 = vpop.f32.mrb[7].mxu1  ;;  %v433_v47 = vmul.f32 0.35355338, %v966_v43  ;;  %v436_v53 = vadd.f32 %v432_v41, %v254_v46 }
 0x3a1   : > { %v431_v48 = vmul.f32 0.35355338, %v418_v44  ;;  %v434_v49 = vadd.f32 %v430_v42, %v252_v40  ;;  %v1080_v40 = vld [vmem:[%s1602_s3 + $0x28] sm:$0xff]  }
 0x3a2   : > { %v437_v55 = vadd.f32 %v433_v47, %v255_v50  ;;  %v444_v56 = vsel %vm257_vm0, %v436_v53, -inf }
 0x3a3   : > { %v438_v51 = vsel %vm257_vm0, %v434_v49, -inf  ;;  %v435_v52 = vadd.f32 %v431_v48, %v253_v45 }
 0x3a4   : > { %439 = vmax.xlane.f32.xlu1 %v438_v51  ;;  %v447_v57 = vsel %vm257_vm0, %v437_v55, -inf }
 0x3a5   : > { %v441_v54 = vsel %vm257_vm0, %v435_v52, -inf }
 0x3a6   : > { %442 = vmax.xlane.f32.xlu0 %v441_v54 }
 0x3a8   : > { %445 = vmax.xlane.f32.xlu1 %v444_v56 }
 0x3aa   : > { %448 = vmax.xlane.f32.xlu0 %v447_v57 }
 0x431   : > { %v440_v58 = vpop.xlane.xlu1 %439 }
 0x432   : > { %v450_v59 = vsub.f32 %v434_v49, %v440_v58  ;;  %v1081_v58 = vld [vmem:[%s1602_s3 + $0x10] sm:$0xff]  }
 0x433   : > { %v443_v60 = vpop.xlane.xlu0 %442  ;;  %984 = vmatpush3.bf16.msra.mxu1 %v1081_v58 }
 0x434   : > { %v451_v62 = vsub.f32 %v435_v52, %v443_v60  ;;  %v454_v1 = vmul.f32 1.442695, %v450_v59  ;;  %985 = vmatprep.subr.bf16.mxu1 %v1245_v4  ;;  %v1082_v59 = vld [vmem:[%s1602_s3 + $0x18] sm:$0xff]  }
 0x435   : > { %v446_v61 = vpop.xlane.xlu1 %445 }
 0x436   : > { %v452_v63 = vsub.f32 %v436_v53, %v446_v61  ;;  %v456_v6 = vmul.f32 1.442695, %v451_v62 }
 0x437   : > { %v449_v2 = vpop.xlane.xlu0 %448  ;;  %986 = vmatpush3.bf16.msra.mxu1 %v1082_v59 }
 0x438   : > { %v458_v3 = vmul.f32 1.442695, %v452_v63  ;;  %v453_v5 = vsub.f32 %v437_v55, %v449_v2 }
 0x43a   : > { %1089 = vpow2.f32 %v458_v3  ;;  %v460_v7 = vmul.f32 1.442695, %v453_v5  ;;  %v1083_v3 = vld [vmem:[%s1602_s3 + $0x30] sm:$0xff]   ;;  %v1084_v5 = vld [vmem:[%s1602_s3 + $0x38] sm:$0xff]  }
 0x43b   : > { %1091 = vpow2.f32 %v454_v1 }
 0x43c   : > { %1093 = vpow2.f32 %v460_v7  ;;  %v1086_v7 = vld [vmem:[%s1602_s3 + $0x48] sm:$0xff]  }
 0x43d   : > { %1095 = vpow2.f32 %v456_v6  ;;  %v1085_v6 = vld [vmem:[%s1602_s3 + $0x40] sm:$0xff]  }
 0x444   : > { %v1090_v8 = vpop.eup %1089 }
 0x445   : > { %v1092_v9 = vpop.eup %1091  ;;  %v468_v10 = vsel %vm257_vm0, %v1090_v8, 0.0 }
 0x446   : > { %v1094_v11 = vpop.eup %1093  ;;  %469 = vadd.xlane.f32.xlu1 %v468_v10  ;;  %v462_v15 = vsel %vm257_vm0, %v1092_v9, 0.0 }
 0x447   : > { %v471_v13 = vsel %vm257_vm0, %v1094_v11, 0.0  ;;  %v1096_v14 = vpop.eup %1095 }
 0x448   : > { %472 = vadd.xlane.f32.xlu0 %v471_v13  ;;  %v465_v16 = vsel %vm257_vm0, %v1096_v14, 0.0 }
 0x44a   : > { %463 = vadd.xlane.f32.xlu1 %v462_v15 }
 0x44c   : > { %466 = vadd.xlane.f32.xlu0 %v465_v16 }
 0x45b   : > { %349 = vrot.lane.b32.xlu1 %v1454_v18, %s1253_s23  ;;  %s1175_s23 = scalar_lea.vmem %s1174_s13, 256 }
 0x462   : > { %352 = vrot.lane.b32.xlu0 %v1454_v18, %s1254_s9 }
 0x4d3   : > { %v470_v21 = vpop.xlane.xlu1 %469 }
 0x4d5   : > { %v473_v22 = vpop.xlane.xlu0 %472 }
 0x4d6   : > { %1097 = vrcp.f32 %v473_v22 }
 0x4d7   : > { %v464_v23 = vpop.xlane.xlu1 %463 }
 0x4d8   : > { %1099 = vrcp.f32 %v464_v23 }
 0x4d9   : > { %1101 = vrcp.f32 %v470_v21  ;;  %v467_v24 = vpop.xlane.xlu0 %466 }
 0x4da   : > { %1103 = vrcp.f32 %v467_v24 }
 0x4db   : > { %v350_v25 = vpop.permute.xlu1 %349 }
 0x4dd   : > { %v353_v26 = vpop.permute.xlu0 %352 }
 0x4de   : > { %v356_v27 = vpack.c.bf16 %v353_v26, %v350_v25 }
 0x4e0   : > { %969 = vmatprep.subr.bf16.mxu0 %v356_v27  ;;  %v1098_v29 = vpop.eup %1097 }
 0x4e1   : > { %970 = vmatpush3.bf16.msra.mxu0 %v356_v27  ;;  %v481_v33 = vmul.f32 %v1098_v29, %v1094_v11 }
 0x4e2   : > { %v1100_v30 = vpop.eup %1099  ;;  %975 = vmatprep.subr.bf16.mxu0 %v1245_v4 }
 0x4e3   : > { %v1102_v31 = vpop.eup %1101  ;;  %v478_v34 = vmul.f32 %v1100_v30, %v1092_v9 }
 0x4e4   : > { %v1104_v32 = vpop.eup %1103  ;;  %v480_v36 = vmul.f32 %v1102_v31, %v1090_v8 }
 0x4e5   : > { %v479_v35 = vmul.f32 %v1104_v32, %v1096_v14 }
 0x4e6   : > { %v483_v38 = vpack.c.bf16 %v481_v33, %v480_v36 }
 0x4e7   : > { %v482_v37 = vpack.c.bf16 %v479_v35, %v478_v34 }
 0x4e9   : > { %971 = vmatprep.mubr.msk.bf16.mxu0 %vm257_vm0, %v482_v37 }
 0x4ea   : > { %972 = vmatmul.mubr.msk.bf16.vlgmr.msra.gmra.mrb[0].mxu0 %vm257_vm0, %v483_v38 }
 0x4eb   : > { %979 = vmatprep.mubr.msk.bf16.mxu0 %vm1246_vm1, %v1245_v4  ;;  %976 = vmatpush3.bf16.msra.mxu0 %v1079_v39 }
 0x4ec   : > { %977 = vmatprep.subr.bf16.mxu0 %v1245_v4 }
 0x4ef   : > { %978 = vmatpush3.bf16.msra.mxu0 %v1080_v40 }
 0x4f0   : > { %991 = vmatprep.subr.bf16.mxu0 %v1245_v4 }
 0x5bd   : > { %v973_v41 = vpop.f32.mrb[0].mxu0 }
 0x5be   : > { %v524_v42 = vpop.f32.mrb[1].mxu0 }
 0x5bf   : > { %v974_v43 = vpop.f32.mrb[2].mxu0 }
 0x5c0   : > { %548 = vrot.lane.b32.xlu0 %v974_v43, %s1254_s9  ;;  %v527_v44 = vpop.f32.mrb[3].mxu0 }
 0x5c1   : > { %540 = vrot.lane.b32.xlu1 %v527_v44, %s1255_s20  ;;  %s1257_s20 = smov 64  }
 0x5c4   : > { %625 = vrot.lane.b32.xlu0 %v1449_v12, %s1248_s7 }
 0x5c5   : > { %544 = vrot.lane.b32.xlu1 %v973_v41, %s1256_s6  ;;  %s242_s6 = scalar_lea.vmem [#allocation7], %s900_s11 }
 0x5c6   : > { %s801_s5 = sshll.u32 %s242_s6, 4  ;;  %s1556_s5 = int_to_ptr.vmem [resolvable:$true] %s801_s5 }
 0x5c7   : > { %s1169_s11 = scalar_lea.vmem %s1556_s5, 128  ;;  %p1176_p13 = scmp.lt.s32.totalorder %s1556_s5, %s1174_s13 }
 0x5c8   : > { %p1170_p6 = scmp.ne.s32.totalorder %s1556_s5, %s1169_s11  ;;  %p1177_p3 = scmp.lt.s32.totalorder %s1175_s23, %s1169_s11 }
 0x5ca   : > { %p1171_p8 = pnand %p1170_p6, %p1375_p12  ;;  %p1178_p7 = por %p1177_p3, %p1176_p13 }
 0x5cc   : > { %p1172_p10 = pneg %p1171_p8 }
 0x5ce   : > { %p1179_p9 = pnand %p1178_p7, %p1172_p10 }
 0x632   : > { %v549_v48 = vpop.permute.xlu0 %548 }
 0x633   : > { %v541_v45 = vpop.permute.xlu1 %540 }
 0x634   : > { %v551_v46 = vsel %vm368_vm2, %v524_v42, %v541_v45 }
 0x636   : > { %v626_v62 = vpop.permute.xlu0 %625 }
 0x637   : > { %v545_v47 = vpop.permute.xlu1 %544 }
 0x638   : > { %v553_v49 = vsel %vm552_vm3, %v551_v46, %v545_v47 }
 0x639   : > { %v555_v50 = vsel %vm554_vm4, %v553_v49, %v549_v48 }
 0x63a   : > { %v556_v51 = vpack.c.bf16 %v555_v50, %v555_v50 }
 0x63c   : > { %980 = vmatmul.mubr.msk.bf16.vlgmr.msra.gmra.mrb[4].mxu0 %vm257_vm0, %v556_v51 }
 0x63d   : > { %999 = vmatprep.mubr.msk.bf16.mxu0 %vm1246_vm1, %v1245_v4  ;;  %992 = vmatpush3.bf16.msra.mxu0 %v1083_v3 }
 0x63e   : > { %993 = vmatprep.subr.bf16.mxu0 %v1245_v4 }
 0x641   : > { %994 = vmatpush3.bf16.msra.mxu0 %v1084_v5 }
 0x642   : > { %995 = vmatprep.subr.bf16.mxu0 %v1245_v4 }
 0x645   : > { %996 = vmatpush3.bf16.msra.mxu0 %v1085_v6 }
 0x646   : > { %997 = vmatprep.subr.bf16.mxu0 %v1245_v4 }
 0x649   : > { %998 = vmatpush3.bf16.msra.mxu0 %v1086_v7 }
 0x70f   : > { %v610_v52 = vpop.f32.mrb[4].mxu0 }
 0x710   : > { %v616_v12 = vadd.f32 %v610_v52, %v1434_v0  ;;  %v981_v53 = vpop.f32.mrb[5].mxu0 }
 0x711   : > { %v613_v54 = vpop.f32.mrb[6].mxu0 }
 0x712   : > { %v982_v55 = vpop.f32.mrb[7].mxu0  ;;  %v617_v56 = vmul.f32 %v616_v12, %v616_v12 }
 0x714   : > { %v618_v57 = vsel %vm257_vm0, %v617_v56, 0.0 }
 0x715   : > { %619 = vadd.xlane.f32.xlu1 %v618_v57 }
 0x7a2   : > { %v620_v0 = vpop.xlane.xlu1 %619 }
 0x7a3   : > { %1105 = vrsqrt.f32 %v620_v0 }
 0x7ad   : > { %v1106_v60 = vpop.eup %1105 }
 0x7ae   : > { %v622_v61 = vmul.f32 5.656854, %v1106_v60 }
 0x7b0   : > { %v623_v63 = vmul.f32 %v622_v61, %v616_v12 }
 0x7b2   : > { %v628_v1 = vmul.f32 %v626_v62, %v623_v63 }
 0x7b4   : > { %v629_v2 = vpack.c.bf16 %v628_v1, %v628_v1 }
 0x7b6   : > { %988 = vmatmul.mubr.msk.bf16.vlgmr.msra.gmra.mrb[8].mxu1 %vm257_vm0, %v629_v2 }
 0x889   : > { %v683_v8 = vpop.f32.mrb[8].mxu1 }
 0x88a   : > { %697 = vrot.lane.b32.xlu0 %v683_v8, %s1257_s20  ;;  %v989_v9 = vpop.f32.mrb[9].mxu1  ;;  %v918_v13 = vmul.f32 -1.442695, %v683_v8 }
 0x88b   : > { %v686_v10 = vpop.f32.mrb[10].mxu1 }
 0x88c   : > { %v990_v11 = vpop.f32.mrb[11].mxu1  ;;  %1107 = vpow2.f32 %v918_v13 }
 0x88e   : > { %779 = vrot.lane.b32.xlu0 %v1454_v18, %s1247_s29  ;;  %s925_s29 = sshll.u32 %s1305_s19, 7  ;;  %s788_s19 = scalar_lea.sflag [#allocation4], %s1420_s25 }
 0x88f   : > { %s1554_s8 = scalar_lea.hbm %s1603_s4, %s925_s29 }
 0x896   : > { %v1108_v14 = vpop.eup %1107 }
 0x897   : > { %v692_v4 = vadd.f32 1.0, %v1108_v14 }
 0x899   : > { %1109 = vrcp.f32 %v692_v4 }
 0x8a3   : > { %v1110_v15 = vpop.eup %1109 }
 0x8a4   : > { %v695_v16 = vmul.f32 %v1110_v15, %v683_v8 }
 0x8fc   : > { %v698_v17 = vpop.permute.xlu0 %697 }
 0x8fd   : > { %v700_v19 = vmul.f32 %v698_v17, %v695_v16 }
 0x8ff   : > { %v701_v20 = vpack.c.bf16 %v700_v19, %v700_v19 }
 0x900   : > { %v780_v24 = vpop.permute.xlu0 %779 }
 0x901   : > { %1000 = vmatmul.mubr.msk.bf16.vlgmr.msra.gmra.mrb[8].mxu0 %vm734_vm5, %v701_v20 }
 0x9d4   : > { %v772_v21 = vpop.f32.mrb[8].mxu0 }
 0x9d5   : > { %v778_v22 = vadd.f32 %v772_v21, %v616_v12  ;;  %v1001_v18 = vpop.f32.mrb[9].mxu0 }
 0x9d6   : > { %v775_v23 = vpop.f32.mrb[10].mxu0 }
 0x9d7   : > { %v782_v25 = vsel %vm257_vm0, %v778_v22, %v1469_v28  ;;  %v1002_v26 = vpop.f32.mrb[11].mxu0 }
 0x9d8   : > { %v784_v27 = vsel %vm783_vm6, %v782_v25, %v780_v24 }
 0x9d9   : > { %v785_v29 = vsel %vm734_vm5, %v784_v27, 0.0 }
 0x9da   : > { %786 = vst [vmem:[%s242_s6] sm:$0xff] %v785_v29 }
 0x9db   : > { %1182 = shalt.err (!%p1179_p9)
}
 0x9dc   : > { %s1183_s25 = scalar_lea.hbm %s1554_s8, 128  ;;  %s1187_s28 = scalar_lea.hbm %s1603_s4, 256 }
 0x9dd   : > { %p1184_p2 = scmp.ne.s32.totalorder %s1554_s8, %s1183_s25  ;;  %p1188_p11 = scmp.lt.u32.totalorder %s1554_s8, %s1603_s4 }
 0x9de   : > { %p1189_p1 = scmp.lt.u32.totalorder %s1187_s28, %s1183_s25  ;;  %p1191_p6 = scmp.lt.u32.totalorder %s1183_s25, %s1554_s8 }
 0x9df   : > { %p1185_p5 = pnand %p1184_p2, %p1375_p12 }
 0x9e0   : > { %p1190_p4 = por %p1189_p1, %p1188_p11 }
 0x9e1   : > { %p1186_p0 = pneg %p1185_p5 }
 0x9e2   : > { %p1192_p8 = por %p1191_p6, %p1190_p4 }
 0x9e4   : > { %p1193_p10 = pnand %p1192_p8, %p1186_p0 }
 0x9e6   : > { %1196 = shalt.err (!%p1193_p10)
}
 0x9e7   : > { %1011 = dma.vmem_to_hbm [thread:$0]  (%p1375_p12), %s1556_s5, 128, %s1554_s8, %s788_s19  }
 0x9e8 PF: > { %s813_s20 = sand.u32 1, %s1227_s15   ;;  %p1618_p13 = scmp.ne.s32.totalorder %s1608_s22, 0 }
 0x9e9   : > { %p1619_p3 = scmp.ge.s32.totalorder %s1239_s18, 2  ;;  %s814_s29 = scalar_lea.sflag [#allocation4], %s813_s20 }
 0x9eb   : > { %p1022_p7 = pnand %p1619_p3, %p1618_p13 }
 0x9ed   : > { %1222 = dma.done.wait (!%p1022_p7), %s814_s29, 128  }
 0x9ee   : > { %1224 = vsyncadd (!%p1022_p7), %s814_s29, 4294967168  ;;  %p18_p9 = scmp.ge.s32.totalorder %s1340_s27, 4   ;;  %s1620_s15 = smov %s1231_s16 }
 0x9ef   : > { %s1621_s16 = smov %s1235_s17  ;;  %s1622_s17 = smov %s1371_s24 }
 0x9f0   : > { %s1623_s18 = smov %s1340_s27  ;;  %20 = sbr.rel (!%p18_p9) target bundleno = 6 (0x6), region = 88 }
 0x9f7   :  { %819 = vsyncpa [#allocation3], 1 }
 0x9f8   :  { %821 = vsyncpa [#allocation3 + $0x1], 1 }
 0x9f9   :  { %822 = vsyncpa [#allocation6], 1 }
 0x9fa   :  { %823 = vsyncpa [#allocation4], 1 }
 0x9fb   :  { %825 = vsyncpa [#allocation4 + $0x1], 1 }

</bundles_post_ra>
